<compile_context>
chip_gen: v7x
topology: tpu7x:2x2x1
jax: 0.10.0
libtpu: 0.0.40
codegen_flags: <defaults>
</compile_context>

<pallas_src>
import jax
import jax.numpy as jnp
from jax.experimental import pallas as pl
from jax.experimental.pallas import tpu as pltpu

HID = 64
OUT = 28 * 28  # 784


def decoder_kernel(x_ref, w1_ref, b1_ref, w2_ref, b2h_ref, o_ref):
    # ---- Linear(latent -> 64) + ReLU (bf16 MXU operands, f32 accumulation) --
    x = x_ref[...].astype(jnp.bfloat16)                      # (TB, latent)
    h = jnp.dot(x, w1_ref[...], preferred_element_type=jnp.float32)
    h = jnp.maximum(h + b1_ref[...], 0.0)                    # (TB, 64)

    # ---- Linear(64 -> 784) + sigmoid --------------------------------------
    y = jnp.dot(h.astype(jnp.bfloat16), w2_ref[...],
                preferred_element_type=jnp.float32)           # (TB, 784)
    # sigmoid(y + b2) == 0.5 * tanh(0.5*y + 0.5*b2) + 0.5 ; b2h_ref == 0.5*b2.
    # Exact identity -> semantics unchanged; single EUP tanh.
    y = jnp.tanh(0.5 * y + b2h_ref[...]) * 0.5 + 0.5

    o_ref[...] = y.astype(o_ref.dtype)


# --------------------------------------------------------------------------- #
# Tiling / VMEM helpers
# --------------------------------------------------------------------------- #
def _round_up(v, m):
    return ((v + m - 1) // m) * m


def _vmem_budget():
    """75% of this chip's per-core VMEM; fall back to 64 MiB (v7x, smallest)."""
    try:
        cap = int(pltpu.get_tpu_info().vmem_capacity_bytes)
    except Exception:  # interpret mode / older runtimes
        cap = 64 << 20
    return int(0.75 * cap)


def _vmem_estimate(tb, latent, out_bytes):
    x_blk = 2 * tb * latent * 4              # double-buffered x tile (f32)
    out_blk = 2 * tb * OUT * out_bytes       # double-buffered output tile
    weights = latent * HID * 2 + HID * OUT * 2 + HID * 4 + OUT * 4  # resident
    temps = tb * OUT * 4 + tb * HID * 4      # in-kernel f32 y / h values
    return x_blk + out_blk + weights + temps + (2 << 20)  # + slack


def _max_tile_for_budget(latent, out_bytes, budget):
    for tb in (1024, 512, 256, 128, 64, 32, 16, 8):
        if _vmem_estimate(tb, latent, out_bytes) <= budget:
            return tb
    return 8


def _choose_batch_tile(batch, tb_cap):
    """Returns (TB, B_pad). Prefers tiles that divide the padded batch so the
    wrapper never has to slice (slice == extra full HBM copy), and >=2 grid
    steps for moderate batches so both v7x TensorCores are used."""
    if batch <= tb_cap:
        if batch >= 256 and batch % 16 == 0:
            return batch // 2, batch          # 2 grid steps, no pad, no slice
        return batch, batch                   # single full-array block
    b8 = _round_up(batch, 8)
    # Largest multiple of 8, <= tb_cap, that divides the 8-rounded batch.
    for cand in range(tb_cap, 7, -8):
        if b8 % cand == 0 and cand >= 128:
            return cand, b8
    # Degenerate divisor structure: fall back to the cap and accept a pad+slice.
    return tb_cap, _round_up(batch, tb_cap)


# --------------------------------------------------------------------------- #
# Params
# --------------------------------------------------------------------------- #
def init_decoder_params(key, latent_dim):
    """Mimics nn.Linear's uniform(-1/sqrt(fan_in), +1/sqrt(fan_in)) init.
    Weights stored pre-transposed as (in_features, out_features)."""
    k1, k2, k3, k4 = jax.random.split(key, 4)
    bound1 = 1.0 / jnp.sqrt(latent_dim)
    w1 = jax.random.uniform(k1, (latent_dim, HID), jnp.float32, -bound1, bound1)
    b1 = jax.random.uniform(k2, (1, HID), jnp.float32, -bound1, bound1)
    bound2 = 1.0 / jnp.sqrt(HID)
    w2 = jax.random.uniform(k3, (HID, OUT), jnp.float32, -bound2, bound2)
    b2 = jax.random.uniform(k4, (1, OUT), jnp.float32, -bound2, bound2)
    return w1, b1, w2, b2


def prepare_decoder_params(w1, b1, w2, b2):
    """One-time prep (hoisted out of the forward call): bf16 MXU weights and
    the pre-scaled bias 0.5*b2 used by the tanh-form sigmoid."""
    return (w1.astype(jnp.bfloat16),
            b1.astype(jnp.float32),
            w2.astype(jnp.bfloat16),
            (0.5 * b2).astype(jnp.float32))


# --------------------------------------------------------------------------- #
# Forward
# --------------------------------------------------------------------------- #
def decoder_forward(x, params, out_dtype=jnp.float32):
    """x: (B, latent) f32; params from prepare_decoder_params().
    Returns (B, 784) in out_dtype (bfloat16 halves output HBM traffic if the
    consumer tolerates it)."""
    w1_bf, b1, w2_bf, b2_half = params
    B, latent = x.shape
    out_bytes = jnp.dtype(out_dtype).itemsize

    budget = _vmem_budget()
    tb_cap = _max_tile_for_budget(latent, out_bytes, budget)
    TB, B_pad = _choose_batch_tile(B, tb_cap)

    x_p = x if B_pad == B else jnp.pad(x, ((0, B_pad - B), (0, 0)))
    grid = (B_pad // TB,)

    out = pl.pallas_call(
        decoder_kernel,
        out_shape=jax.ShapeDtypeStruct((B_pad, OUT), out_dtype),
        grid=grid,
        in_specs=[
            pl.BlockSpec((TB, latent), lambda i: (i, 0)),
            pl.BlockSpec(w1_bf.shape, lambda i: (0, 0)),     # VMEM-resident
            pl.BlockSpec(b1.shape, lambda i: (0, 0)),
            pl.BlockSpec(w2_bf.shape, lambda i: (0, 0)),
            pl.BlockSpec(b2_half.shape, lambda i: (0, 0)),
        ],
        out_specs=pl.BlockSpec((TB, OUT), lambda i: (i, 0)),
        compiler_params=pltpu.CompilerParams(
            dimension_semantics=("parallel",),
            vmem_limit_bytes=budget,
        ),
    )(x_p, w1_bf, b1, w2_bf, b2_half)

    # Only ragged batches (not a multiple of the tile) pay this slice.
    return out if B_pad == B else out[:B]


if __name__ == "__main__":
    latent_dim = 32
    batch = 8

    key = jax.random.PRNGKey(0)
    kx, kp = jax.random.split(key)
    x = jax.random.normal(kx, (batch, latent_dim), jnp.float32)
    w1, b1, w2, b2 = init_decoder_params(kp, latent_dim)
    params = prepare_decoder_params(w1, b1, w2, b2)

    out = decoder_forward(x, params)
    out = jax.block_until_ready(out)

    # Plain-JAX f32 reference; bf16 matmul operands -> loose tolerance.
    h_ref = jnp.maximum(x @ w1 + b1, 0.0)
    y_ref = jax.nn.sigmoid(h_ref @ w2 + b2)
    assert out.shape == (batch, 28 * 28)
    assert jnp.allclose(out, y_ref, atol=2e-2, rtol=0.0)

    print("KERNEL_OK")
</pallas_src>

<mosaic_0001>
module attributes {stable_mosaic.version = 11 : i64} {
  func.func @decoder_kernel(%arg0: i32, %arg1: memref<8x32xf32, #tpu.memory_space<vmem>>, %arg2: memref<32x64xbf16, #tpu.memory_space<vmem>>, %arg3: memref<1x64xf32, #tpu.memory_space<vmem>>, %arg4: memref<64x784xbf16, #tpu.memory_space<vmem>>, %arg5: memref<1x784xf32, #tpu.memory_space<vmem>>, %arg6: memref<8x784xf32, #tpu.memory_space<vmem>>) attributes {dimension_semantics = [#tpu.dimension_semantics<parallel>], iteration_bounds = array<i64: 1>, scalar_prefetch = 0 : i64, scratch_operands = 0 : i64, tpu.core_type = #tpu.core_type<tc>, window_params = [{transform_indices = @transform_0, window_bounds = array<i64: 8, 32>}, {pipeline_mode = #tpu.pipeline_mode<synchronous>, transform_indices = @transform_1, window_bounds = array<i64: 32, 64>}, {pipeline_mode = #tpu.pipeline_mode<synchronous>, transform_indices = @transform_2, window_bounds = array<i64: 1, 64>}, {pipeline_mode = #tpu.pipeline_mode<synchronous>, transform_indices = @transform_3, window_bounds = array<i64: 64, 784>}, {pipeline_mode = #tpu.pipeline_mode<synchronous>, transform_indices = @transform_4, window_bounds = array<i64: 1, 784>}, {transform_indices = @transform_5, window_bounds = array<i64: 8, 784>}]} {
    %c0 = arith.constant 0 : index
    %c0_0 = arith.constant 0 : index
    %0 = vector.load %arg1[%c0, %c0_0] : memref<8x32xf32, #tpu.memory_space<vmem>>, vector<8x32xf32>
    %1 = arith.truncf %0 : vector<8x32xf32> to vector<8x32xbf16>
    %c0_1 = arith.constant 0 : index
    %c0_2 = arith.constant 0 : index
    %2 = vector.load %arg2[%c0_1, %c0_2] : memref<32x64xbf16, #tpu.memory_space<vmem>>, vector<32x64xbf16>
    %cst = arith.constant dense<0.000000e+00> : vector<8x64xf32>
    %3 = tpu.matmul %1, %2, %cst {dimension_numbers = #tpu.dot_dimension_numbers<[1], [0], [0], [1], [0, 0, 1, 1], [], []>} : vector<8x32xbf16>, vector<32x64xbf16>, vector<8x64xf32> -> vector<8x64xf32>
    %c0_3 = arith.constant 0 : index
    %c0_4 = arith.constant 0 : index
    %4 = vector.load %arg3[%c0_3, %c0_4] : memref<1x64xf32, #tpu.memory_space<vmem>>, vector<1x64xf32>
    %5 = vector.broadcast %4 : vector<1x64xf32> to vector<8x64xf32>
    %6 = arith.addf %3, %5 : vector<8x64xf32>
    %cst_5 = arith.constant 0.000000e+00 : f32
    %7 = vector.broadcast %cst_5 : f32 to vector<8x64xf32>
    %8 = arith.maximumf %6, %7 : vector<8x64xf32>
    %9 = arith.truncf %8 : vector<8x64xf32> to vector<8x64xbf16>
    %c0_6 = arith.constant 0 : index
    %c0_7 = arith.constant 0 : index
    %10 = vector.load %arg4[%c0_6, %c0_7] : memref<64x784xbf16, #tpu.memory_space<vmem>>, vector<64x784xbf16>
    %cst_8 = arith.constant dense<0.000000e+00> : vector<8x784xf32>
    %11 = tpu.matmul %9, %10, %cst_8 {dimension_numbers = #tpu.dot_dimension_numbers<[1], [0], [0], [1], [0, 0, 1, 1], [], []>} : vector<8x64xbf16>, vector<64x784xbf16>, vector<8x784xf32> -> vector<8x784xf32>
    %cst_9 = arith.constant 5.000000e-01 : f32
    %12 = vector.broadcast %cst_9 : f32 to vector<8x784xf32>
    %13 = arith.mulf %12, %11 : vector<8x784xf32>
    %c0_10 = arith.constant 0 : index
    %c0_11 = arith.constant 0 : index
    %14 = vector.load %arg5[%c0_10, %c0_11] : memref<1x784xf32, #tpu.memory_space<vmem>>, vector<1x784xf32>
    %15 = vector.broadcast %14 : vector<1x784xf32> to vector<8x784xf32>
    %16 = arith.addf %13, %15 : vector<8x784xf32>
    %17 = math.tanh %16 : vector<8x784xf32>
    %cst_12 = arith.constant 5.000000e-01 : f32
    %18 = vector.broadcast %cst_12 : f32 to vector<8x784xf32>
    %19 = arith.mulf %17, %18 : vector<8x784xf32>
    %cst_13 = arith.constant 5.000000e-01 : f32
    %20 = vector.broadcast %cst_13 : f32 to vector<8x784xf32>
    %21 = arith.addf %19, %20 : vector<8x784xf32>
    %c0_14 = arith.constant 0 : index
    %c0_15 = arith.constant 0 : index
    %22 = vector.load %arg6[%c0_14, %c0_15] : memref<8x784xf32, #tpu.memory_space<vmem>>, vector<8x784xf32>
    tpu.vector_store %arg6[%c0_14, %c0_15], %21 {strides = array<i32>} : memref<8x784xf32, #tpu.memory_space<vmem>>, vector<8x784xf32>,
    return
  }
  func.func @transform_0(%arg0: i32) -> (i32, i32) {
    %c0_i32 = arith.constant 0 : i32
    %c0_i32_0 = arith.constant 0 : i32
    return %arg0, %c0_i32 : i32, i32
  }
  func.func @transform_1(%arg0: i32) -> (i32, i32) {
    %c0_i32 = arith.constant 0 : i32
    %c0_i32_0 = arith.constant 0 : i32
    %c0_i32_1 = arith.constant 0 : i32
    return %c0_i32, %c0_i32_0 : i32, i32
  }
  func.func @transform_2(%arg0: i32) -> (i32, i32) {
    %c0_i32 = arith.constant 0 : i32
    %c0_i32_0 = arith.constant 0 : i32
    %c0_i32_1 = arith.constant 0 : i32
    return %c0_i32, %c0_i32_0 : i32, i32
  }
  func.func @transform_3(%arg0: i32) -> (i32, i32) {
    %c0_i32 = arith.constant 0 : i32
    %c0_i32_0 = arith.constant 0 : i32
    %c0_i32_1 = arith.constant 0 : i32
    return %c0_i32, %c0_i32_0 : i32, i32
  }
  func.func @transform_4(%arg0: i32) -> (i32, i32) {
    %c0_i32 = arith.constant 0 : i32
    %c0_i32_0 = arith.constant 0 : i32
    %c0_i32_1 = arith.constant 0 : i32
    return %c0_i32, %c0_i32_0 : i32, i32
  }
  func.func @transform_5(%arg0: i32) -> (i32, i32) {
    %c0_i32 = arith.constant 0 : i32
    %c0_i32_0 = arith.constant 0 : i32
    return %arg0, %c0_i32 : i32, i32
  }
}

</mosaic_0001>

<bundles_post_ra>
// kernel: tpu_custom_call.1
= control target key start
LH: loop header
LB: loop body
LE: loop exit
PB: predicated region body
PF: predicated region fallthrough
CT: control target
= control target key end

     0   :  { %10 = vsyncpa [#allocation3], 0  ;;  %s905_s0 = inlined_call_operand.hbm [shape: f32[8,32], index: 0, kind: input, shape index: {}]   ;;  %s906_s1 = inlined_call_operand.hbm [shape: bf16[32,64], index: 1, kind: input, shape index: {}]   ;;  %s907_s2 = inlined_call_operand.vmem [shape: f32[1,64], index: 2, kind: input, shape index: {}]   ;;  %s908_s3 = inlined_call_operand.hbm [shape: bf16[64,784], index: 3, kind: input, shape index: {}]   ;;  %s909_s4 = inlined_call_operand.vmem [shape: f32[1,784], index: 4, kind: input, shape index: {}]   ;;  %s910_s5 = inlined_call_operand.hbm [shape: f32[8,784], index: 5, kind: output, shape index: {}]  }
   0x1   :  { %11 = vsyncpa [#allocation6], 0 }
   0x2   :  { %12 = vsyncpa [#allocation4], 0  ;;  %s796_s18 = smov [#allocation5]   ;;  %s702_s22 = scalar_lea.hbm %s906_s1, 256 }
   0x3   :  { %s28_s19 = sshll.u32 %s796_s18, 4  ;;  %p703_p0 = scmp.ne.s32.totalorder %s906_s1, %s702_s22  ;;  %s29_s19 = int_to_ptr.vmem [resolvable:$true] %s28_s19 }
   0x4   :  { %p706_p1 = scmp.lt.u32.totalorder %s702_s22, %s906_s1 }
   0x6   :  { %p708_p2 = pnand %p706_p1, %p703_p0 }
   0x8   :  { %711 = shalt.err (!%p708_p2)
}
   0x9   :  { %s712_s27 = scalar_lea.vmem %s29_s19, 256  ;;  %p717_p4 = scmp.lt.s32.totalorder %s29_s19, %s29_s19 }
   0xa   :  { %p713_p3 = scmp.ne.s32.totalorder %s29_s19, %s712_s27  ;;  %p718_p5 = scmp.lt.s32.totalorder %s712_s27, %s712_s27 }
   0xc   :  { %p719_p6 = por %p718_p5, %p717_p4 }
   0xe   :  { %p720_p7 = pnand %p719_p6, %p713_p3 }
  0x10   :  { %723 = shalt.err (!%p720_p7)
}
  0x11   :  { %s797_s28 = smov 64   ;;  %s798_s29 = smov 4  }
  0x12   :  { %34 = dma.hbm_to_vmem [thread:$0]  %s906_s1, 256, %s29_s19, [#allocation6], %s797_s28, %s797_s28, %s798_s29  }
  0x13   :  { %s799_s7 = smov [#allocation2]   ;;  %s800_s9 = smov [#allocation7]  }
  0x14   :  { %s19_s8 = sshll.u32 %s799_s7, 4  ;;  %s42_s10 = sshll.u32 %s800_s9, 4  ;;  %s20_s8 = int_to_ptr.vmem [resolvable:$true] %s19_s8  ;;  %s43_s10 = int_to_ptr.vmem [resolvable:$true] %s42_s10 }
  0x15   :  { %s724_s13 = scalar_lea.hbm %s905_s0, 128 }
  0x16   :  { %p725_p8 = scmp.ne.s32.totalorder %s905_s0, %s724_s13  ;;  %p728_p9 = scmp.lt.u32.totalorder %s724_s13, %s905_s0 }
  0x18   :  { %p730_p10 = pnand %p728_p9, %p725_p8 }
  0x1a   :  { %733 = shalt.err (!%p730_p10)
}
  0x1b   :  { %s734_s1 = scalar_lea.vmem %s20_s8, 128  ;;  %p739_p12 = scmp.lt.s32.totalorder %s20_s8, %s20_s8 }
  0x1c   :  { %p735_p11 = scmp.ne.s32.totalorder %s20_s8, %s734_s1  ;;  %p740_p13 = scmp.lt.s32.totalorder %s734_s1, %s734_s1 }
  0x1e   :  { %p741_p0 = por %p740_p13, %p739_p12 }
  0x20   :  { %p742_p1 = pnand %p741_p0, %p735_p11 }
  0x22   :  { %745 = shalt.err (!%p742_p1)
}
  0x23   :  { %22 = dma.hbm_to_vmem [thread:$0]  %s905_s0, 128, %s20_s8, [#allocation3]  }
  0x24   :  { %s746_s22 = scalar_lea.hbm %s908_s3, 3584 }
  0x25   :  { %p747_p2 = scmp.ne.s32.totalorder %s908_s3, %s746_s22  ;;  %p750_p3 = scmp.lt.u32.totalorder %s746_s22, %s908_s3 }
  0x27   :  { %p752_p4 = pnand %p750_p3, %p747_p2 }
  0x29   :  { %755 = shalt.err (!%p752_p4)
}
  0x2a   :  { %s756_s27 = scalar_lea.vmem %s43_s10, 3584  ;;  %p761_p6 = scmp.lt.s32.totalorder %s43_s10, %s43_s10 }
  0x2b   :  { %p757_p5 = scmp.ne.s32.totalorder %s43_s10, %s756_s27  ;;  %p762_p7 = scmp.lt.s32.totalorder %s756_s27, %s756_s27 }
  0x2d   :  { %p763_p8 = por %p762_p7, %p761_p6 }
  0x2f   :  { %p764_p9 = pnand %p763_p8, %p757_p5 }
  0x31   :  { %767 = shalt.err (!%p764_p9)
}
  0x32   :  { %s801_s0 = smov 448   ;;  %s802_s28 = smov 28  }
  0x33   :  { %48 = dma.hbm_to_vmem [thread:$0]  %s908_s3, 3584, %s43_s10, [#allocation6], %s801_s0, %s801_s0, %s802_s28  }
  0x34   :  { %790 = dma.done.wait [#allocation3], 128  }
  0x35   :  { %791 = vsyncadd [#allocation3], 4294967168 }
  0x36   :  { %792 = dma.done.wait [#allocation6], 3840  }
  0x37   :  { %793 = vsyncadd [#allocation6], 4294963456  ;;  %v803_v0 = vmov 0.0   ;;  %vm804_vm0 = vmmov 0   ;;  %v646_v1 = vld [vmem:[#allocation5] sm:$0xff]   ;;  %v647_v2 = vld [vmem:[#allocation5 + $0x8] sm:$0xff]   ;;  %v484_v42 = vlaneseq }
  0x38   :  { %615 = vmatprep.subr.bf16.mxu0 %v803_v0  ;;  %619 = vmatprep.mubr.msk.bf16.mxu0 %vm804_vm0, %v803_v0  ;;  %v61_v3 = vld [vmem:[#allocation2] sm:$0xff]  ;;  %v648_v4 = vld [vmem:[#allocation7 + $0x4] ss:$28 sps:$4 sm:$0xff]   ;;  %v654_v8 = vld [vmem:[#allocation7 + $0x3c] ss:$28 sps:$4 sm:$0xff]   ;;  %vm86_vm1 = vcmask 261120  }
  0x39   :  { %616 = vmatpush3.bf16.msra.mxu0 %v646_v1  ;;  %v652_v5 = vld [vmem:[#allocation7 + $0xc] ss:$28 sps:$4 sm:$0xff]   ;;  %v653_v6 = vld [vmem:[#allocation7] ss:$28 sps:$4 sm:$0xff]   ;;  %v62_v7 = vpack.c.bf16 %v61_v3, %v61_v3  ;;  %312 = vmatprep.subr.bf16.mxu1 %v648_v4  ;;  %v659_v11 = vld [vmem:[#allocation7 + $0x38] ss:$28 sps:$4 sm:$0xff]  }
  0x3a   :  { %617 = vmatprep.subr.bf16.mxu0 %v803_v0  ;;  %v650_v9 = vld [vmem:[#allocation7 + $0x8] ss:$28 sps:$4 sm:$0xff]   ;;  %313 = vmatpush1.bf16.msra.mxu1 %v653_v6  ;;  %v660_v12 = vld [vmem:[#allocation7 + $0x74] ss:$28 sps:$4 sm:$0xff]   ;;  %v656_v13 = vld [vmem:[#allocation7 + $0x40] ss:$28 sps:$4 sm:$0xff]  }
  0x3b   :  { %314 = vmatprep.subr.bf16.mxu1 %v654_v8  ;;  %v658_v10 = vld [vmem:[#allocation7 + $0x44] ss:$28 sps:$4 sm:$0xff]   ;;  %v664_v14 = vld [vmem:[#allocation7 + $0x7c] ss:$28 sps:$4 sm:$0xff]   ;;  %v665_v15 = vld [vmem:[#allocation7 + $0x70] ss:$28 sps:$4 sm:$0xff]  }
  0x3c   :  { %v662_v16 = vld [vmem:[#allocation7 + $0x78] ss:$28 sps:$4 sm:$0xff]   ;;  %v666_v17 = vld [vmem:[#allocation7 + $0xac] ss:$28 sps:$4 sm:$0xff]   ;;  %v805_v22 = vmov 0   ;;  %vm308_vm2 = vcmask 523264  }
  0x3d   :  { %618 = vmatpush3.bf16.msra.mxu0 %v647_v2  ;;  %v670_v18 = vld [vmem:[#allocation7 + $0xb4] ss:$28 sps:$4 sm:$0xff]   ;;  %v671_v20 = vld [vmem:[#allocation7 + $0xa8] ss:$28 sps:$4 sm:$0xff]   ;;  %344 = vmatprep.mubr.bf16.mxu1 %v805_v22  ;;  %v680_v37 = vld [vmem:[#allocation7 + $0x80] ss:$28 sps:$4 sm:$0xff]  }
  0x3e   :  { %353 = vmatprep.subr.bf16.mxu0 %v652_v5  ;;  %315 = vmatpush1.bf16.msra.mxu1 %v659_v11  ;;  %v668_v19 = vld [vmem:[#allocation7 + $0xb0] ss:$28 sps:$4 sm:$0xff]   ;;  %v571_v23 = vld [vmem:[%s907_s2] ss:$0 sm:$0xff]  ;;  %v675_v31 = vld [vmem:[#allocation7 + $0x18] ss:$28 sps:$4 sm:$0xff]  }
  0x3f   :  { %316 = vmatprep.subr.bf16.mxu1 %v660_v12  ;;  %v674_v21 = vld [vmem:[#allocation7 + $0x14] ss:$28 sps:$4 sm:$0xff]   ;;  %v678_v33 = vld [vmem:[#allocation7 + $0x4c] ss:$28 sps:$4 sm:$0xff]   ;;  %v682_v36 = vld [vmem:[#allocation7 + $0x84] ss:$28 sps:$4 sm:$0xff]  }
  0x40   :  { %620 = vmatmul.mubr.msk.bf16.vlgmr.msra.gmra.mrb[0].mxu0 %vm86_vm1, %v62_v7  ;;  %v672_v30 = vld [vmem:[#allocation7 + $0x10] ss:$28 sps:$4 sm:$0xff]   ;;  %v676_v34 = vld [vmem:[#allocation7 + $0x48] ss:$28 sps:$4 sm:$0xff]   ;;  %v686_v39 = vld [vmem:[#allocation7 + $0xbc] ss:$28 sps:$4 sm:$0xff]  }
  0x41   :  { %354 = vmatpush1.bf16.msra.mxu0 %v650_v9  ;;  %385 = vmatprep.mubr.bf16.mxu0 %v805_v22  ;;  %v679_v35 = vld [vmem:[#allocation7 + $0x50] ss:$28 sps:$4 sm:$0xff]   ;;  %v683_v38 = vld [vmem:[#allocation7 + $0x88] ss:$28 sps:$4 sm:$0xff]   ;;  %v684_v40 = vld [vmem:[#allocation7 + $0xb8] ss:$28 sps:$4 sm:$0xff]  }
  0x42   :  { %355 = vmatprep.subr.bf16.mxu0 %v658_v10  ;;  %317 = vmatpush1.bf16.msra.mxu1 %v665_v15  ;;  %v687_v41 = vld [vmem:[#allocation7 + $0xc0] ss:$28 sps:$4 sm:$0xff]   ;;  %v485_v43 = vshrl.u32 %v484_v42, 7  ;;  %v482_v46 = vld [vmem:[%s909_s4] sm:$0x7f]  ;;  %s806_s4 = smov [#allocation8]  }
  0x43   :  { %318 = vmatprep.subr.bf16.mxu1 %v666_v17  ;;  %s561_s8 = sshll.u32 %s806_s4, 4  ;;  %vm553_vm3 = vcmask 130048   ;;  %s562_s8 = int_to_ptr.vmem [resolvable:$true] %s561_s8 }
  0x44   :  { %v486_v44 = vsub.s32 0, %v485_v43  ;;  %v494_v45 = vsub.s32 2, %v485_v43  ;;  %v490_v47 = vsub.s32 1, %v485_v43  ;;  %v498_v48 = vsub.s32 3, %v485_v43  ;;  %s768_s9 = scalar_lea.vmem %s562_s8, 896  ;;  %p773_p11 = scmp.lt.s32.totalorder %s562_s8, %s562_s8 }
  0x45   :  { %356 = vmatpush1.bf16.msra.mxu0 %v656_v13  ;;  %v502_v5 = vsub.s32 4, %v485_v43  ;;  %v510_v6 = vsub.s32 6, %v485_v43  ;;  %v506_v7 = vsub.s32 5, %v485_v43  ;;  %p769_p10 = scmp.ne.s32.totalorder %s562_s8, %s768_s9  ;;  %p774_p12 = scmp.lt.s32.totalorder %s768_s9, %s768_s9 }
  0x46   :  { %357 = vmatprep.subr.bf16.mxu0 %v664_v14  ;;  %319 = vmatpush1.bf16.msra.mxu1 %v671_v20  ;;  %v487_v49 = vrot.slane %v482_v46, %v486_v44  ;;  %v495_v50 = vrot.slane %v482_v46, %v494_v45  ;;  %v491_v53 = vrot.slane %v482_v46, %v490_v47 }
  0x47   :  { %394 = vmatprep.subr.bf16.mxu1 %v674_v21  ;;  %v499_v54 = vrot.slane %v482_v46, %v498_v48  ;;  %v503_v9 = vrot.slane %v482_v46, %v502_v5  ;;  %v511_v10 = vrot.slane %v482_v46, %v510_v6  ;;  %v507_v15 = vrot.slane %v482_v46, %v506_v7  ;;  %p775_p13 = por %p774_p12, %p773_p11 }
  0x49   :  { %358 = vmatpush1.bf16.msra.mxu0 %v662_v16  ;;  %p776_p0 = pnand %p775_p13, %p769_p10 }
  0x4a   :  { %359 = vmatprep.subr.bf16.mxu0 %v670_v18 }
  0x4d   :  { %360 = vmatpush1.bf16.msra.mxu0 %v668_v19 }
  0x4e   :  { %623 = vmatprep.subr.bf16.mxu0 %v803_v0 }
 0x113   :  { %v124_v24 = vpop.f32.mrb[0].mxu0 }
 0x114   :  { %v125_v25 = vadd.f32 %v571_v23, %v124_v24  ;;  %v621_v26 = vpop.f32.mrb[1].mxu0 }
 0x115   :  { %v127_v27 = vpop.f32.mrb[2].mxu0 }
 0x116   :  { %v130_v28 = vmax.f32 %v125_v25, 0.0  ;;  %v622_v29 = vpop.f32.mrb[3].mxu0 }
 0x118   :  { %v131_v32 = vpack.c.bf16 %v130_v28, %v130_v28 }
 0x11a   :  { %603 = vmatmul.mubr.msk.bf16.vlgmr.msra.gmra.mrb[0].mxu1 %vm308_vm2, %v131_v32  ;;  %604 = vmatmul.mubr.msk.bf16.vlgmr.msra.gmra.mrb[4].mxu0 %vm308_vm2, %v131_v32 }
 0x11b   :  { %395 = vmatpush1.bf16.msra.mxu1 %v672_v30  ;;  %624 = vmatpush3.bf16.msra.mxu0 %v675_v31 }
 0x11c   :  { %396 = vmatprep.subr.bf16.mxu1 %v678_v33  ;;  %625 = vmatprep.subr.bf16.mxu0 %v803_v0 }
 0x11d   :  { %426 = vmatprep.mubr.bf16.mxu1 %v805_v22  ;;  %631 = vmatprep.mubr.msk.bf16.mxu0 %vm804_vm0, %v803_v0 }
 0x11f   :  { %397 = vmatpush1.bf16.msra.mxu1 %v676_v34  ;;  %626 = vmatpush3.bf16.msra.mxu0 %v679_v35 }
 0x120   :  { %398 = vmatprep.subr.bf16.mxu1 %v682_v36  ;;  %627 = vmatprep.subr.bf16.mxu0 %v803_v0 }
 0x123   :  { %399 = vmatpush1.bf16.msra.mxu1 %v680_v37  ;;  %628 = vmatpush3.bf16.msra.mxu0 %v683_v38 }
 0x124   :  { %400 = vmatprep.subr.bf16.mxu1 %v686_v39  ;;  %629 = vmatprep.subr.bf16.mxu0 %v803_v0 }
 0x127   :  { %401 = vmatpush1.bf16.msra.mxu1 %v684_v40  ;;  %630 = vmatpush3.bf16.msra.mxu0 %v687_v41 }
 0x12a   :  { %605 = vmatmul.mubr.msk.bf16.vlgmr.msra.gmra.mrb[4].mxu1 %vm308_vm2, %v131_v32  ;;  %632 = vmatmul.mubr.msk.bf16.vlgmr.msra.gmra.mrb[8].mxu0 %vm308_vm2, %v131_v32 }
 0x1ed   :  { %v346_v51 = vpop.f32.mrb[0].mxu1  ;;  %v387_v52 = vpop.f32.mrb[4].mxu0 }
 0x1ee   :  { %v475_v55 = vmul.f32 0.5, %v346_v51  ;;  %v477_v56 = vmul.f32 0.5, %v387_v52  ;;  %v348_v57 = vpop.f32.mrb[1].mxu1  ;;  %v389_v58 = vpop.f32.mrb[5].mxu0 }
 0x1ef   :  { %v476_v59 = vmul.f32 0.5, %v348_v57  ;;  %v478_v60 = vmul.f32 0.5, %v389_v58  ;;  %v350_v61 = vpop.f32.mrb[2].mxu1  ;;  %v391_v62 = vpop.f32.mrb[6].mxu0 }
 0x1f0   :  { %v519_v63 = vadd.f32 %v487_v49, %v475_v55  ;;  %v521_v0 = vadd.f32 %v495_v50, %v477_v56  ;;  %v351_v1 = vpop.f32.mrb[3].mxu1  ;;  %v392_v2 = vpop.f32.mrb[7].mxu0 }
 0x1f1   :  { %v520_v3 = vadd.f32 %v491_v53, %v476_v59  ;;  %v522_v4 = vadd.f32 %v499_v54, %v478_v60 }
 0x1f2   :  { %688 = vtanh.f32 %v519_v63 }
 0x1f3   :  { %690 = vtanh.f32 %v521_v0 }
 0x1f4   :  { %692 = vtanh.f32 %v520_v3 }
 0x1f5   :  { %694 = vtanh.f32 %v522_v4 }
 0x1fc   :  { %v689_v8 = vpop.eup %688 }
 0x1fd   :  { %v691_v11 = vpop.eup %690  ;;  %v533_v12 = vmul.f32 0.5, %v689_v8  ;;  %v428_v13 = vpop.f32.mrb[4].mxu1 }
 0x1fe   :  { %v469_v14 = vpop.f32.mrb[8].mxu0  ;;  %v693_v16 = vpop.eup %692  ;;  %v535_v17 = vmul.f32 0.5, %v691_v11  ;;  %v479_v18 = vmul.f32 0.5, %v428_v13 }
 0x1ff   :  { %v481_v19 = vmul.f32 0.5, %v469_v14  ;;  %v430_v20 = vpop.f32.mrb[5].mxu1  ;;  %v633_v21 = vpop.f32.mrb[9].mxu0  ;;  %v540_v23 = vadd.f32 0.5, %v533_v12  ;;  %v534_v24 = vmul.f32 0.5, %v693_v16 }
 0x200   :  { %v695_v22 = vpop.eup %694  ;;  %v480_v25 = vmul.f32 0.5, %v430_v20  ;;  %v432_v26 = vpop.f32.mrb[6].mxu1  ;;  %v542_v28 = vadd.f32 0.5, %v535_v17  ;;  %v523_v30 = vadd.f32 %v503_v9, %v479_v18 }
 0x201   :  { %v472_v27 = vpop.f32.mrb[10].mxu0  ;;  %v536_v29 = vmul.f32 0.5, %v695_v22  ;;  %v525_v31 = vadd.f32 %v511_v10, %v481_v19  ;;  %v433_v32 = vpop.f32.mrb[7].mxu1  ;;  %547 = vst [vmem:[#allocation8] sm:$0xff] %v540_v23  ;;  %v541_v34 = vadd.f32 0.5, %v534_v24 }
 0x202   :  { %v634_v33 = vpop.f32.mrb[11].mxu0  ;;  %v524_v35 = vadd.f32 %v507_v15, %v480_v25  ;;  %549 = vst [vmem:[#allocation8 + $0x10] sm:$0xff] %v542_v28  ;;  %696 = vtanh.f32 %v523_v30 }
 0x203   :  { %v543_v36 = vadd.f32 0.5, %v536_v29  ;;  %548 = vst [vmem:[#allocation8 + $0x8] sm:$0xff] %v541_v34  ;;  %698 = vtanh.f32 %v525_v31 }
 0x204   :  { %700 = vtanh.f32 %v524_v35 }
 0x205   :  { %550 = vst [vmem:[#allocation8 + $0x18] sm:$0xff] %v543_v36 }
 0x20c   :  { %v697_v37 = vpop.eup %696 }
 0x20d   :  { %v699_v38 = vpop.eup %698  ;;  %v537_v39 = vmul.f32 0.5, %v697_v37 }
 0x20e   :  { %v701_v40 = vpop.eup %700  ;;  %v539_v41 = vmul.f32 0.5, %v699_v38 }
 0x20f   :  { %v544_v42 = vadd.f32 0.5, %v537_v39  ;;  %v538_v43 = vmul.f32 0.5, %v701_v40 }
 0x210   :  { %v546_v44 = vadd.f32 0.5, %v539_v41 }
 0x211   :  { %551 = vst [vmem:[#allocation8 + $0x20] sm:$0xff] %v544_v42  ;;  %v545_v45 = vadd.f32 0.5, %v538_v43 }
 0x212   :  { %554 = vst.msk [vmem:[#allocation8 + $0x30] sm:$0xff] %vm553_vm3, %v546_v44 }
 0x213   :  { %552 = vst [vmem:[#allocation8 + $0x28] sm:$0xff] %v545_v45 }
 0x214   :  { %779 = shalt.err (!%p776_p0)
}
 0x215   :  { %s780_s12 = scalar_lea.hbm %s910_s5, 896 }
 0x216   :  { %p781_p1 = scmp.ne.s32.totalorder %s910_s5, %s780_s12  ;;  %p784_p2 = scmp.lt.u32.totalorder %s780_s12, %s910_s5 }
 0x218   :  { %p786_p3 = pnand %p784_p2, %p781_p1 }
 0x21a   :  { %789 = shalt.err (!%p786_p3)
}
 0x21b   :  { %564 = dma.vmem_to_hbm [thread:$0]  %s562_s8, 896, %s910_s5, [#allocation4]  }
 0x21c   :  { %794 = dma.done.wait [#allocation4], 896  }
 0x21d   :  { %795 = vsyncadd [#allocation4], 4294966400 }
 0x21e   :  { %568 = vsyncpa [#allocation3], 1 }
 0x21f   :  { %569 = vsyncpa [#allocation6], 1 }
 0x220   :  { %570 = vsyncpa [#allocation4], 1 }

</bundles_post_ra>
